<compile_context>
chip_gen: v7x
topology: tpu7x:2x2x1
jax: 0.10.0
libtpu: 0.0.40
codegen_flags: <defaults>
</compile_context>

<pallas_src>
import math

import jax
import jax.numpy as jnp
from jax.experimental import pallas as pl
from jax.experimental.pallas import tpu as pltpu


# ---------------------------------------------------------------------------
# Kernel: a single VPU add of the VMEM-resident PE tile (already in x.dtype).
# ---------------------------------------------------------------------------
def _add_pe_kernel(x_ref, pe_ref, o_ref):
    # x_ref / o_ref: (tB, T).  pe_ref: (1, T) -> broadcast over batch sublanes.
    o_ref[...] = x_ref[...] + pe_ref[...]


# ---------------------------------------------------------------------------
# PE table (computed once, outside the kernel — exactly the PyTorch buffer).
# ---------------------------------------------------------------------------
def _make_pe_table(S, D):
    """(S, D) float32 sinusoidal table: sin on even features, cos on odd."""
    assert D % 2 == 0, "PositionalEncoding requires an even d_model"
    position = jnp.arange(S, dtype=jnp.float32)[:, None]                  # (S, 1)
    div_term = jnp.exp(jnp.arange(0, D, 2, dtype=jnp.float32)
                       * (-math.log(10000.0) / D))                        # (D/2,)
    angles = position * div_term                                          # (S, D/2)
    pe = jnp.zeros((S, D), jnp.float32)
    pe = pe.at[:, 0::2].set(jnp.sin(angles))
    pe = pe.at[:, 1::2].set(jnp.cos(angles))
    return pe


def _hw_budgets():
    """(block_target_bytes, vmem_limit_bytes), generation dependent."""
    try:
        vmem = pltpu.get_tpu_info().vmem_capacity_bytes
    except Exception:
        vmem = 64 * 1024 * 1024
    if vmem >= 100 * 1024 * 1024:        # v5e / v6e: 128 MiB physical VMEM
        return 8 << 20, 64 << 20
    return 4 << 20, 40 << 20             # v7x (64 MiB per TC) and unknown parts


def _choose_tiles(B, N, itemsize, target_bytes):
    """Pick (tB, T) block dims for the 2-D (B, N) view.

    (8, 128) BlockSpec rule: T is a multiple of 128 or == N; tB is a multiple
    of 8 or == B.  tB * T * itemsize ~<= target_bytes (soft).
    """
    budget = max(128, target_bytes // itemsize)          # elements per block
    if B * N <= budget:
        return B, N                                      # one block, one DMA
    if B <= 8:
        T = max(128, (budget // B) // 128 * 128)
        return B, min(N, T)
    if 8 * N <= budget:
        tB = (budget // N) // 8 * 8
        return min(B, tB), N
    T = max(128, (budget // 8) // 128 * 128)
    return 8, min(N, T)


# ---------------------------------------------------------------------------
# Wrapper
# ---------------------------------------------------------------------------
def positional_encoding(x, block_target_bytes=None):
    """x: [B, S, D] -> x + pe[None, :S, :]   (PyTorch PositionalEncoding.forward)."""
    B, S, D = x.shape
    N = S * D
    itemsize = x.dtype.itemsize

    target, vmem_limit = _hw_budgets()
    if block_target_bytes is not None:
        target = block_target_bytes
    tB, T = _choose_tiles(B, N, itemsize, target)
    n_t = pl.cdiv(N, T)
    n_b = pl.cdiv(B, tB)

    # PE: input-independent (constant-folded under jit), pre-cast to x.dtype so
    # the kernel does no per-step convert and PE DMA/VMEM bytes are halved for
    # bf16 activations.  NOTE(numerics): pre-rounding PE to bf16 differs from
    # PyTorch's f32 promotion by <= 1 ulp(bf16); exact for f32 inputs.
    pe2 = _make_pe_table(S, D).astype(x.dtype).reshape(1, N)

    # Lane-dense layout: flatten (S, D) into one trailing axis of length S*D.
    x2 = x.reshape(B, N)

    if T == N:
        # Whole PE row fits in one block: constant index map -> exactly one PE
        # DMA for the entire kernel.  (The second, idle pipeline buffer it gets
        # is small; single-DMA behaviour does not depend on pl.Buffered(1).)
        pe_spec = pl.BlockSpec((1, N), lambda t, b: (0, 0))
    else:
        # PE tiled along the same T tiles as x; batch varies fastest, so each
        # PE tile stays VMEM-resident across the whole batch loop.
        pe_spec = pl.BlockSpec((1, T), lambda t, b: (0, t))

    out2 = pl.pallas_call(
        _add_pe_kernel,
        out_shape=jax.ShapeDtypeStruct((B, N), x.dtype),
        grid_spec=pltpu.PrefetchScalarGridSpec(
            num_scalar_prefetch=0,
            grid=(n_t, n_b),                       # batch is the fastest axis
            in_specs=[
                pl.BlockSpec((tB, T), lambda t, b: (b, t)),
                pe_spec,
            ],
            out_specs=pl.BlockSpec((tB, T), lambda t, b: (b, t)),
        ),
        compiler_params=pltpu.CompilerParams(
            # Pure elementwise, no accumulator: both axes are independent, so
            # v7x megacore can shard the grid across its two TensorCores.
            dimension_semantics=("parallel", "parallel"),
            vmem_limit_bytes=vmem_limit,
        ),
        cost_estimate=pl.CostEstimate(
            flops=B * N,
            transcendentals=0,
            bytes_accessed=(2 * B * N + N) * itemsize,
        ),
    )(x2, pe2)
    return out2.reshape(B, S, D)


# ---------------------------------------------------------------------------
# Plain-JAX reference matching the PyTorch module exactly.
# ---------------------------------------------------------------------------
def _reference(x):
    B, S, D = x.shape
    return x + _make_pe_table(S, D)[None].astype(x.dtype)


if __name__ == "__main__":
    key = jax.random.PRNGKey(0)

    # Shapes implied by the module's forward: [batch, seq_len, d_model].
    B, S, D = 2, 8, 32
    x = jax.random.normal(key, (B, S, D), dtype=jnp.float32)

    fn = jax.jit(positional_encoding)
    out = fn(x)
    jax.block_until_ready(out)
    assert out.shape == (B, S, D) and out.dtype == x.dtype
    assert jnp.allclose(out, _reference(x), atol=1e-5, rtol=1e-5)

    # Also exercise the tiled path (T < N, tB < B) with a forced-small block
    # target to validate the index maps used at realistic shapes.
    xb = jax.random.normal(jax.random.PRNGKey(1), (16, 128, 64), dtype=jnp.float32)
    outb = positional_encoding(xb, block_target_bytes=64 * 1024)
    jax.block_until_ready(outb)
    assert jnp.allclose(outb, _reference(xb), atol=1e-5, rtol=1e-5)

    print("KERNEL_OK")
</pallas_src>

<mosaic_0001>
module attributes {stable_mosaic.version = 11 : i64} {
  func.func @_add_pe_kernel(%arg0: i32, %arg1: i32, %arg2: memref<2x256xf32, #tpu.memory_space<vmem>>, %arg3: memref<1x256xf32, #tpu.memory_space<vmem>>, %arg4: memref<2x256xf32, #tpu.memory_space<vmem>>) attributes {dimension_semantics = [#tpu.dimension_semantics<parallel>, #tpu.dimension_semantics<parallel>], iteration_bounds = array<i64: 1, 1>, scalar_prefetch = 0 : i64, scratch_operands = 0 : i64, tpu.core_type = #tpu.core_type<tc>, window_params = [{transform_indices = @transform_0, window_bounds = array<i64: 2, 256>}, {pipeline_mode = #tpu.pipeline_mode<synchronous>, transform_indices = @transform_1, window_bounds = array<i64: 1, 256>}, {transform_indices = @transform_2, window_bounds = array<i64: 2, 256>}]} {
    %c0 = arith.constant 0 : index
    %c0_0 = arith.constant 0 : index
    %0 = vector.load %arg2[%c0, %c0_0] : memref<2x256xf32, #tpu.memory_space<vmem>>, vector<2x256xf32>
    %c0_1 = arith.constant 0 : index
    %c0_2 = arith.constant 0 : index
    %1 = vector.load %arg3[%c0_1, %c0_2] : memref<1x256xf32, #tpu.memory_space<vmem>>, vector<1x256xf32>
    %2 = vector.broadcast %1 : vector<1x256xf32> to vector<2x256xf32>
    %3 = arith.addf %0, %2 : vector<2x256xf32>
    %c0_3 = arith.constant 0 : index
    %c0_4 = arith.constant 0 : index
    %4 = vector.load %arg4[%c0_3, %c0_4] : memref<2x256xf32, #tpu.memory_space<vmem>>, vector<2x256xf32>
    tpu.vector_store %arg4[%c0_3, %c0_4], %3 {strides = array<i32>} : memref<2x256xf32, #tpu.memory_space<vmem>>, vector<2x256xf32>,
    return
  }
  func.func @transform_0(%arg0: i32, %arg1: i32) -> (i32, i32) {
    %c0_i32 = arith.constant 0 : i32
    return %arg1, %arg0 : i32, i32
  }
  func.func @transform_1(%arg0: i32, %arg1: i32) -> (i32, i32) {
    %c0_i32 = arith.constant 0 : i32
    %c0_i32_0 = arith.constant 0 : i32
    %c0_i32_1 = arith.constant 0 : i32
    return %c0_i32, %c0_i32_0 : i32, i32
  }
  func.func @transform_2(%arg0: i32, %arg1: i32) -> (i32, i32) {
    %c0_i32 = arith.constant 0 : i32
    return %arg1, %arg0 : i32, i32
  }
}

</mosaic_0001>

<bundles_post_ra>
// kernel: positional_encoding.1
= control target key start
LH: loop header
LB: loop body
LE: loop exit
PB: predicated region body
PF: predicated region fallthrough
CT: control target
= control target key end

     0   :  { %v14_v0 = vlaneseq  ;;  %v38_v1 = vmov 1983009808   ;;  %s63_s1 = inlined_call_operand.vmem [shape: f32[1,256], index: 1, kind: input, shape index: {}]   ;;  %s64_s0 = inlined_call_operand.vmem [shape: f32[2,256], index: 0, kind: input, shape index: {}]   ;;  %s65_s2 = inlined_call_operand.vmem [shape: f32[2,256], index: 2, kind: output, shape index: {}]  }
   0x1   :  { %v24_v2 = vunpack.c.l.s4 %v38_v1  ;;  %v12_v4 = vld [vmem:[%s63_s1] sm:$0x3] }
   0x2   :  { %v15_v3 = vshrl.u32 %v14_v0, 7  ;;  %v11_v12 = vld [vmem:[%s64_s0] sm:$0xf] }
   0x3   :  { %v25_v5 = vunpack.c.0.s8 %v24_v2 }
   0x4   :  { %v16_v6 = vsub.s32 0, %v15_v3  ;;  %v20_v7 = vsub.s32 1, %v15_v3 }
   0x5   :  { %v28_v10 = vsub.s32 %v25_v5, %v15_v3 }
   0x6   :  { %v17_v8 = vrot.slane %v12_v4, %v16_v6  ;;  %v21_v9 = vrot.slane %v12_v4, %v20_v7 }
   0x8   :  { %v22_v11 = vcombine.low %v17_v8, %v21_v9 }
   0xa   :  { %v29_v13 = vrot.slane %v22_v11, %v28_v10 }
   0xc   :  { %v31_v14 = vadd.f32 %v29_v13, %v11_v12 }
   0xe   :  { %32 = vst [vmem:[%s65_s2] sm:$0xf] %v31_v14 }

</bundles_post_ra>
